<compile_context>
chip_gen: v5e
topology: v5e:2x2
jax: 0.10.0
libtpu: 0.0.40
codegen_flags: <defaults>
</compile_context>

<pallas_src>
from functools import partial

import jax
import jax.numpy as jnp
from jax import lax
from jax.experimental import pallas as pl
from jax.experimental.pallas import tpu as pltpu


def _round_up(x, m):
    return (x + m - 1) // m * m


def _conv_bn_silu_kernel(p_ref, w_ref, shift_ref, o_ref, *, approx_silu):
    # p_ref:     (row_tile, Kdim_pad)   im2col patches (bf16/f32), VMEM
    # w_ref:     (Kdim_pad, cout_pad)   conv weight with BN scale folded in
    # shift_ref: (1, cout_pad)          folded BN shift (f32)
    # o_ref:     (row_tile, cout_pad)   lane-dense output tile
    y = jnp.dot(p_ref[...], w_ref[...], preferred_element_type=jnp.float32)
    y = y + shift_ref[...]                                # fused BN (inference)
    if approx_silu:
        # exp and the approximate reciprocal both go to the EUP slot.
        sig = pl.reciprocal(1.0 + jnp.exp(-y), approx=True)
    else:
        sig = jax.nn.sigmoid(y)
    o_ref[...] = (y * sig).astype(o_ref.dtype)            # SiLU


def conv_bn_silu(x_nchw, weight_oihw, gamma, beta, running_mean, running_var,
                 eps=1e-5, mxu_dtype=jnp.bfloat16, out_dtype=None,
                 row_tile_target=512,
                 vmem_tile_budget=24 * 1024 * 1024,       # raise on v5e/v6e
                 vmem_limit_bytes=32 * 1024 * 1024):      # raise on v5e/v6e
    """Pallas equivalent of Conv.forward(x): k=3, s=1, p=autopad, g=1, d=1."""
    N, Cin, H, W = x_nchw.shape
    Cout, Cin_w, KH, KW = weight_oihw.shape
    assert Cin_w == Cin, "groups != 1 not supported"
    ph, pw = KH // 2, KW // 2                             # autopad, d == 1

    out_dtype = x_nchw.dtype if out_dtype is None else out_dtype
    mm_dtype = jnp.float32 if mxu_dtype is None else mxu_dtype

    # ---- fold BN (eval mode) into the conv weight, in f32 -------------------
    scale = (gamma / jnp.sqrt(running_var + eps)).astype(jnp.float32)    # (Cout,)
    shift = (beta - running_mean * scale).astype(jnp.float32)            # (Cout,)
    # OIHW -> (KH, KW, Cin, Cout); scale folded BEFORE any low-precision cast.
    w_mat = jnp.transpose(weight_oihw, (2, 3, 1, 0)).astype(jnp.float32)
    w_mat = (w_mat * scale[None, None, None, :]).reshape(KH * KW * Cin, Cout)
    w_mat = w_mat.astype(mm_dtype)

    # ---- im2col in the MXU dtype (cast BEFORE the 9x inflation) -------------
    x_nhwc = jnp.transpose(x_nchw, (0, 2, 3, 1)).astype(mm_dtype)
    x_pad = jnp.pad(x_nhwc, ((0, 0), (ph, ph), (pw, pw), (0, 0)))
    taps = [lax.slice(x_pad, (0, kh, kw, 0), (N, kh + H, kw + W, Cin))
            for kh in range(KH) for kw in range(KW)]
    Kdim = KH * KW * Cin
    patches = jnp.concatenate(taps, axis=-1).reshape(N * H * W, Kdim)

    # ---- lane/sublane-friendly padding & tile selection ----------------------
    Kdim_pad = _round_up(Kdim, 128)        # lane axis of patches / MXU feed
    cout_pad = _round_up(Cout, 128)        # lane-dense output -> unmasked vst
    rows = N * H * W

    row_tile = max(16, min(row_tile_target, _round_up(rows, 16)))
    # Give the megacore "parallel" rows axis >=2 blocks when rows allow (v7x).
    while row_tile >= rows and row_tile > 16:
        row_tile = max(16, _round_up(row_tile // 2, 16))

    mm_b = jnp.dtype(mm_dtype).itemsize
    out_b = jnp.dtype(out_dtype).itemsize

    def _tile_bytes(rt):
        return (2 * rt * Kdim_pad * mm_b          # double-buffered patches tile
                + 2 * Kdim_pad * cout_pad * mm_b  # resident weight (x2, conservative)
                + 2 * rt * cout_pad * out_b       # double-buffered output tile
                + rt * cout_pad * 4)              # f32 accumulator / epilogue

    while _tile_bytes(row_tile) > vmem_tile_budget and row_tile > 16:
        row_tile = max(16, _round_up(row_tile // 2, 16))

    rows_pad = _round_up(rows, row_tile)

    if rows_pad > rows or Kdim_pad > Kdim:
        patches = jnp.pad(patches, ((0, rows_pad - rows), (0, Kdim_pad - Kdim)))
    w_mat = jnp.pad(w_mat, ((0, Kdim_pad - Kdim), (0, cout_pad - Cout)))
    shift2 = jnp.pad(shift, (0, cout_pad - Cout)).reshape(1, cout_pad)

    grid = (rows_pad // row_tile,)
    kernel = partial(_conv_bn_silu_kernel, approx_silu=mxu_dtype is not None)

    out = pl.pallas_call(
        kernel,
        out_shape=jax.ShapeDtypeStruct((rows_pad, cout_pad), out_dtype),
        grid=grid,
        in_specs=[
            pl.BlockSpec((row_tile, Kdim_pad), lambda i: (i, 0)),
            pl.BlockSpec((Kdim_pad, cout_pad), lambda i: (0, 0)),  # fetched once
            pl.BlockSpec((1, cout_pad), lambda i: (0, 0)),         # fetched once
        ],
        out_specs=pl.BlockSpec((row_tile, cout_pad), lambda i: (i, 0)),
        compiler_params=pltpu.CompilerParams(
            dimension_semantics=("parallel",),
            vmem_limit_bytes=vmem_limit_bytes,
        ),
    )(patches, w_mat, shift2)

    out = out[:rows, :Cout].reshape(N, H, W, Cout)      # drop row/Cout padding
    return jnp.transpose(out, (0, 3, 1, 2))             # back to NCHW


def _reference(x, w, gamma, beta, mean, var, eps=1e-5):
    """Pure-JAX reference of conv + bn(eval) + silu in NCHW."""
    y = lax.conv_general_dilated(
        x, w, window_strides=(1, 1),
        padding=((w.shape[2] // 2,) * 2, (w.shape[3] // 2,) * 2),
        dimension_numbers=("NCHW", "OIHW", "NCHW"))
    scale = gamma / jnp.sqrt(var + eps)
    shift = beta - mean * scale
    y = y * scale[None, :, None, None] + shift[None, :, None, None]
    return y * jax.nn.sigmoid(y)


if __name__ == "__main__":
    # Module config: Conv(c1=4, c2=8, k=3, s=1) -> conv weight (8,4,3,3), BN(8).
    N, C1, C2, H, W, K = 2, 4, 8, 16, 16, 3

    key = jax.random.PRNGKey(0)
    kx, kw, kg, kb, km, kv = jax.random.split(key, 6)
    x = jax.random.normal(kx, (N, C1, H, W), dtype=jnp.float32)
    weight = 0.1 * jax.random.normal(kw, (C2, C1, K, K), dtype=jnp.float32)
    gamma = 1.0 + 0.1 * jax.random.normal(kg, (C2,), dtype=jnp.float32)
    beta = 0.1 * jax.random.normal(kb, (C2,), dtype=jnp.float32)
    running_mean = 0.1 * jax.random.normal(km, (C2,), dtype=jnp.float32)
    running_var = 1.0 + 0.1 * jax.random.uniform(kv, (C2,), dtype=jnp.float32)

    # Perf path: bf16 MXU operands, f32 accumulation / BN / SiLU (approx recip).
    out_bf16 = conv_bn_silu(x, weight, gamma, beta, running_mean, running_var,
                            mxu_dtype=jnp.bfloat16)
    # Strict path: f32 operands end-to-end, exact sigmoid.
    out_f32 = conv_bn_silu(x, weight, gamma, beta, running_mean, running_var,
                           mxu_dtype=None)
    out_bf16, out_f32 = jax.block_until_ready((out_bf16, out_f32))

    ref = _reference(x, weight, gamma, beta, running_mean, running_var)
    assert out_bf16.shape == (N, C2, H, W)
    assert out_f32.shape == (N, C2, H, W)
    assert jnp.allclose(out_f32, ref, atol=1e-4, rtol=1e-4), "f32 mismatch"
    assert jnp.allclose(out_bf16, ref, atol=3e-2, rtol=3e-2), "bf16 mismatch"

    print("KERNEL_OK")
</pallas_src>

<mosaic_0001>
module attributes {stable_mosaic.version = 11 : i64} {
  func.func @_conv_bn_silu_kernel(%arg0: i32, %arg1: memref<256x128xbf16, #tpu.memory_space<vmem>>, %arg2: memref<128x128xbf16, #tpu.memory_space<vmem>>, %arg3: memref<1x128xf32, #tpu.memory_space<vmem>>, %arg4: memref<256x128xf32, #tpu.memory_space<vmem>>) attributes {dimension_semantics = [#tpu.dimension_semantics<parallel>], iteration_bounds = array<i64: 2>, scalar_prefetch = 0 : i64, scratch_operands = 0 : i64, tpu.core_type = #tpu.core_type<tc>, window_params = [{transform_indices = @transform_0, window_bounds = array<i64: 256, 128>}, {pipeline_mode = #tpu.pipeline_mode<synchronous>, transform_indices = @transform_1, window_bounds = array<i64: 128, 128>}, {pipeline_mode = #tpu.pipeline_mode<synchronous>, transform_indices = @transform_2, window_bounds = array<i64: 1, 128>}, {transform_indices = @transform_3, window_bounds = array<i64: 256, 128>}]} {
    %c0 = arith.constant 0 : index
    %c0_0 = arith.constant 0 : index
    %0 = vector.load %arg1[%c0, %c0_0] : memref<256x128xbf16, #tpu.memory_space<vmem>>, vector<256x128xbf16>
    %c0_1 = arith.constant 0 : index
    %c0_2 = arith.constant 0 : index
    %1 = vector.load %arg2[%c0_1, %c0_2] : memref<128x128xbf16, #tpu.memory_space<vmem>>, vector<128x128xbf16>
    %cst = arith.constant dense<0.000000e+00> : vector<256x128xf32>
    %2 = tpu.matmul %0, %1, %cst {dimension_numbers = #tpu.dot_dimension_numbers<[1], [0], [0], [1], [0, 0, 1, 1], [], []>} : vector<256x128xbf16>, vector<128x128xbf16>, vector<256x128xf32> -> vector<256x128xf32>
    %c0_3 = arith.constant 0 : index
    %c0_4 = arith.constant 0 : index
    %3 = vector.load %arg3[%c0_3, %c0_4] : memref<1x128xf32, #tpu.memory_space<vmem>>, vector<1x128xf32>
    %4 = vector.broadcast %3 : vector<1x128xf32> to vector<256x128xf32>
    %5 = arith.addf %2, %4 : vector<256x128xf32>
    %cst_5 = arith.constant 0.000000e+00 : f32
    %6 = vector.broadcast %cst_5 : f32 to vector<256x128xf32>
    %7 = arith.subf %6, %5 : vector<256x128xf32>
    %8 = math.exp %7 : vector<256x128xf32>
    %cst_6 = arith.constant 1.000000e+00 : f32
    %9 = vector.broadcast %cst_6 : f32 to vector<256x128xf32>
    %10 = arith.addf %9, %8 : vector<256x128xf32>
    %11 = tpu.reciprocal %10 {approx = true} : vector<256x128xf32> -> vector<256x128xf32>
    %12 = arith.mulf %5, %11 : vector<256x128xf32>
    %c0_7 = arith.constant 0 : index
    %c0_8 = arith.constant 0 : index
    %13 = vector.load %arg4[%c0_7, %c0_8] : memref<256x128xf32, #tpu.memory_space<vmem>>, vector<256x128xf32>
    tpu.vector_store %arg4[%c0_7, %c0_8], %12 {strides = array<i32>} : memref<256x128xf32, #tpu.memory_space<vmem>>, vector<256x128xf32>,
    return
  }
  func.func @transform_0(%arg0: i32) -> (i32, i32) {
    %c0_i32 = arith.constant 0 : i32
    %c0_i32_0 = arith.constant 0 : i32
    return %arg0, %c0_i32 : i32, i32
  }
  func.func @transform_1(%arg0: i32) -> (i32, i32) {
    %c0_i32 = arith.constant 0 : i32
    %c0_i32_0 = arith.constant 0 : i32
    %c0_i32_1 = arith.constant 0 : i32
    return %c0_i32, %c0_i32_0 : i32, i32
  }
  func.func @transform_2(%arg0: i32) -> (i32, i32) {
    %c0_i32 = arith.constant 0 : i32
    %c0_i32_0 = arith.constant 0 : i32
    %c0_i32_1 = arith.constant 0 : i32
    return %c0_i32, %c0_i32_0 : i32, i32
  }
  func.func @transform_3(%arg0: i32) -> (i32, i32) {
    %c0_i32 = arith.constant 0 : i32
    %c0_i32_0 = arith.constant 0 : i32
    return %arg0, %c0_i32 : i32, i32
  }
}

</mosaic_0001>

<bundles_post_ra>
// kernel: tpu_custom_call.1
= control target key start
LH: loop header
LB: loop body
LE: loop exit
PB: predicated region body
PF: predicated region fallthrough
CT: control target
= control target key end

     0   :  { %8 = vsyncpa [#allocation3], 0  ;;  %s1682_s0 = inlined_call_operand.hbm [shape: bf16[512,128], index: 0, kind: input, shape index: {}]   ;;  %s1683_s1 = inlined_call_operand.hbm [shape: bf16[128,128], index: 1, kind: input, shape index: {}]   ;;  %s1684_s2 = inlined_call_operand.vmem [shape: f32[1,128], index: 2, kind: input, shape index: {}]   ;;  %s1685_s3 = inlined_call_operand.hbm [shape: f32[512,128], index: 3, kind: output, shape index: {}]  }
   0x1   :  { %10 = vsyncpa [#allocation3 + $0x1], 0 }
   0x2   :  { %11 = vsyncpa [#allocation6], 0 }
   0x3   :  { %12 = vsyncpa [#allocation4], 0 }
   0x4   :  { %14 = vsyncpa [#allocation4 + $0x1], 0  ;;  %s1327_s12 = smov 0   ;;  %s1329_s13 = smov 0  }
   0x5   :  { %s1331_s14 = smov 0   ;;  %s1333_s15 = smov 0  }
   0x6 LB: > { %s1348_s16 = sadd.s32 4294967295, %s1300_s15   ;;  %s818_s17 = sadd.s32 4294967294, %s1300_s15   ;;  %s1300_s15 = sphi %s1333_s15, %s1695_s15   ;;  %s1296_s14 = sphi %s1331_s14, %s1694_s14   ;;  %s1292_s13 = sphi %s1329_s13, %s1693_s13   ;;  %s1288_s12 = sphi %s1327_s12, %s1692_s12  }
   0x7   : > { %p40_p0 = scmp.ne.s32.totalorder %s1292_s13, %s1288_s12  ;;  %p41_p1 = scmp.eq.s32.totalorder %s1348_s16, 0 }
   0x8   : > { %p106_p2 = scmp.eq.s32.totalorder %s1348_s16, 1  ;;  %p112_p3 = scmp.eq.s32.totalorder %s818_s17, 1 }
   0x9   : > { %p1357_p4 = por %p41_p1, %p40_p0  ;;  %p819_p5 = scmp.ge.s32.totalorder %s1300_s15, 1 }
   0xa   : > { %p1362_p6 = por %p112_p3, %p40_p0  ;;  %p119_p7 = scmp.lt.s32.totalorder %s1300_s15, 3 }
   0xb   : > { %s130_s22 = sshll.u32 %s1683_s1, 4  ;;  %s1302_s24 = smov [#allocation5]   ;;  %s131_s22 = int_to_ptr.hbm [resolvable:$true] %s130_s22 }
   0xc   : > { %p1370_p8 = pnand %p819_p5, %p119_p7  ;;  %s132_s25 = sshll.u32 %s1302_s24, 4  ;;  %s133_s25 = int_to_ptr.vmem [resolvable:$true] %s132_s25 }
   0xd   : > { %s1380_s26 = sadd.s32 1, %s1300_s15   ;;  %s1303_s27 = smov 64  }
   0xe   : > { %p988_p9 = pneg %p1370_p8  ;;  %s1304_s28 = smov 4  }
   0xf   : > { %s24_s29 = ssub.s32 %s1300_s15, %s1380_s26  ;;  %s27_s30 = sadd.s32 1, %s1296_s14 }
  0x10   : > { %p989_p10 = pnand %p988_p9, %p41_p1  ;;  %p25_p12 = scmp.eq.s32.totalorder %s24_s29, 0 }
  0x11   : > { %p34_p13 = scmp.ne.s32.totalorder %s1296_s14, %s1292_s13  ;;  %p35_p0 = scmp.eq.s32.totalorder %s1300_s15, 0 }
  0x12   : > { %991 = dma.hbm_to_vmem [thread:$0]  (!%p989_p10), %s131_s22, 1024, %s133_s25, [#allocation6], %s1303_s27, %s1303_s27, %s1304_s28  }
  0x13   : > { %s1392_s4 = scalar_select %p25_p12, %s1296_s14, %s27_s30  }
  0x14   : > { %p1396_p3 = por %p106_p2, %p34_p13  ;;  %p1001_p5 = scmp.lt.s32.totalorder %s1300_s15, 2 }
  0x15   : > { %s149_s6 = sand.u32 1, %s1296_s14   ;;  %s930_s7 = sshll.u32 %s1300_s15, 7 }
  0x16   : > { %p36_p7 = por %p35_p0, %p34_p13  ;;  %s822_s8 = sshll.u32 %s149_s6, 7 }
  0x17   : > { %s158_s11 = scalar_lea.hbm %s1682_s0, %s930_s7  ;;  %s153_s20 = scalar_lea.vmem [#allocation2], %s822_s8 }
  0x18   : > { %s159_s17 = sshll.u32 %s158_s11, 4  ;;  %s161_s21 = sshll.u32 %s153_s20, 4  ;;  %s160_s17 = int_to_ptr.hbm [resolvable:$true] %s159_s17  ;;  %s162_s21 = int_to_ptr.vmem [resolvable:$true] %s161_s21 }
  0x19   : > { %p1406_p9 = pnand %p1001_p5, %p36_p7  ;;  %s150_s24 = scalar_lea.sflag [#allocation3], %s149_s6 }
  0x1a   : > { %s1200_s25 = sshra.s32 %s160_s17, 4  ;;  %s1207_s8 = scalar_lea.hbm %s1682_s0, 256  ;;  %s1201_s25 = int_to_ptr.hbm [resolvable:$true] %s1200_s25 }
  0x1b   : > { %s1202_s29 = scalar_lea.hbm %s1201_s25, 128  ;;  %p1204_p10 = pneg %p1406_p9 }
  0x1c   : > { %p1203_p2 = scmp.ne.s32.totalorder %s1201_s25, %s1202_s29  ;;  %p1208_p0 = scmp.lt.s32.totalorder %s1201_s25, %s1682_s0 }
  0x1d   : > { %p1209_p5 = scmp.lt.s32.totalorder %s1207_s8, %s1202_s29 }
  0x1e   : > { %p1205_p12 = pnand %p1204_p10, %p1203_p2 }
  0x1f   : > { %p1210_p7 = por %p1209_p5, %p1208_p0 }
  0x20   : > { %p1206_p13 = pneg %p1205_p12 }
  0x22   : > { %p1211_p11 = pnand %p1210_p7, %p1206_p13 }
  0x24   : > { %1214 = shalt.err (!%p1211_p11)
}
  0x25   : > { %995 = dma.hbm_to_vmem [thread:$0]  (!%p1406_p9), %s160_s17, 2048, %s162_s21, %s150_s24, %s1303_s27, %s1303_s27, %s1304_s28  }
  0x26   : > { %173 = sbr.rel (%p1370_p8) target bundleno = 302 (0x12e), region = 32  ;;  %s1426_s6 = sand.u32 (!%p1370_p8), 1, %s1292_s13  }
  0x27   : > { %s826_s11 = sshll.u32 (!%p1370_p8), %s1426_s6, 7  ;;  %s176_s20 = scalar_lea.sflag (!%p1370_p8), [#allocation3], %s1426_s6 }
  0x28   : > { %s1430_s25 = scalar_lea.vmem (!%p1370_p8), [#allocation2], %s826_s11 }
  0x2b   : > { %1275 = dma.done.wait (%p1357_p4), %s176_s20, 2048  }
  0x2c   : > { %1277 = vsyncadd (%p1357_p4), %s176_s20, 4294965248 }
  0x2d   : > { %1279 = dma.done.wait (%p41_p1), [#allocation6], 1024  }
  0x2e   : > { %1281 = vsyncadd (%p41_p1), [#allocation6], 4294966272  ;;  %v954_v0 = vld [vmem:[#allocation5 + $0x38] sm:$0xff]  ;;  %v953_v1 = vld [vmem:[#allocation5 + $0x30] sm:$0xff]  ;;  %s828_s27 = sshll.u32 %s1426_s6, 8  ;;  %s955_s17 = sshll.u32 %s1348_s16, 8 }
  0x2f   : > { %406 = vmatpush.bf16.msra.mxu0 %v954_v0  ;;  %956 = vmatpush.bf16.msra.mxu1 %v954_v0  ;;  %v952_v2 = vld [vmem:[#allocation5 + $0x28] sm:$0xff]  ;;  %v951_v3 = vld [vmem:[#allocation5 + $0x20] sm:$0xff]  ;;  %v950_v4 = vld [vmem:[#allocation5 + $0x18] sm:$0xff]  ;;  %s1502_s28 = scalar_lea.vmem [#allocation7], %s828_s27  ;;  %s731_s24 = scalar_lea.hbm %s1685_s3, %s955_s17 }
  0x30   : > { %957 = vmatpush.bf16.msra.mxu2 %v954_v0  ;;  %958 = vmatpush.bf16.msra.mxu3 %v954_v0  ;;  %v949_v5 = vld [vmem:[#allocation5 + $0x10] sm:$0xff]  ;;  %v948_v6 = vld [vmem:[#allocation5 + $0x8] sm:$0xff]  ;;  %v947_v7 = vld [vmem:[#allocation5] sm:$0xff]  ;;  %s732_s29 = sshll.u32 %s1502_s28, 4  ;;  %s734_s16 = sshll.u32 %s731_s24, 4  ;;  %s733_s29 = int_to_ptr.vmem [resolvable:$true] %s732_s29  ;;  %s735_s16 = int_to_ptr.hbm [resolvable:$true] %s734_s16 }
  0x31   : > { %v931_v8 = vld [vmem:[%s1430_s25] sm:$0xff]  ;;  %v932_v12 = vld [vmem:[%s1430_s25 + $0x8] sm:$0xff]  ;;  %v933_v16 = vld [vmem:[%s1430_s25 + $0x10] sm:$0xff]  ;;  %s720_s30 = scalar_lea.sflag [#allocation4], %s1426_s6  ;;  %s1244_s7 = sshra.s32 %s735_s16, 4  ;;  %s1245_s7 = int_to_ptr.hbm [resolvable:$true] %s1244_s7 }
  0x32   : > { %v935_v9 = vld [vmem:[%s1430_s25 + $0x20] sm:$0xff]  ;;  %v936_v13 = vld [vmem:[%s1430_s25 + $0x28] sm:$0xff]  ;;  %v937_v17 = vld [vmem:[%s1430_s25 + $0x30] sm:$0xff]  ;;  %s1246_s8 = scalar_lea.hbm %s1245_s7, 256  ;;  %s1250_s11 = scalar_lea.hbm %s1685_s3, 512 }
  0x33   : > { %407 = vmatpush.bf16.msra.mxu0 %v953_v1  ;;  %959 = vmatpush.bf16.msra.mxu1 %v953_v1  ;;  %v939_v10 = vld [vmem:[%s1430_s25 + $0x40] sm:$0xff]  ;;  %v940_v14 = vld [vmem:[%s1430_s25 + $0x48] sm:$0xff]  ;;  %v941_v18 = vld [vmem:[%s1430_s25 + $0x50] sm:$0xff]  ;;  %p1247_p1 = scmp.ne.s32.totalorder %s1245_s7, %s1246_s8  ;;  %p1251_p11 = scmp.lt.s32.totalorder %s1245_s7, %s1685_s3 }
  0x34   : > { %960 = vmatpush.bf16.msra.mxu2 %v953_v1  ;;  %961 = vmatpush.bf16.msra.mxu3 %v953_v1  ;;  %v943_v11 = vld [vmem:[%s1430_s25 + $0x60] sm:$0xff]  ;;  %v944_v15 = vld [vmem:[%s1430_s25 + $0x68] sm:$0xff]  ;;  %v945_v19 = vld [vmem:[%s1430_s25 + $0x70] sm:$0xff]  ;;  %p1252_p9 = scmp.lt.s32.totalorder %s1250_s11, %s1246_s8 }
  0x35   : > { %v934_v20 = vld [vmem:[%s1430_s25 + $0x18] sm:$0xff]  ;;  %v1459_v24 = vld [vmem:[%s1684_s2] ss:$0 sm:$0xff]  ;;  %p1248_p4 = pnand %p1247_p1, %p1396_p3 }
  0x36   : > { %v938_v21 = vld [vmem:[%s1430_s25 + $0x38] sm:$0xff]  ;;  %p1253_p2 = por %p1252_p9, %p1251_p11 }
  0x37   : > { %408 = vmatpush.bf16.msra.mxu0 %v952_v2  ;;  %962 = vmatpush.bf16.msra.mxu1 %v952_v2  ;;  %v942_v22 = vld [vmem:[%s1430_s25 + $0x58] sm:$0xff]  ;;  %p1249_p8 = pneg %p1248_p4 }
  0x38   : > { %963 = vmatpush.bf16.msra.mxu2 %v952_v2  ;;  %964 = vmatpush.bf16.msra.mxu3 %v952_v2  ;;  %v946_v23 = vld [vmem:[%s1430_s25 + $0x78] sm:$0xff] }
  0x39   : > { %p1254_p10 = pnand %p1253_p2, %p1249_p8 }
  0x3b   : > { %409 = vmatpush.bf16.msra.mxu0 %v951_v3  ;;  %965 = vmatpush.bf16.msra.mxu1 %v951_v3 }
  0x3c   : > { %966 = vmatpush.bf16.msra.mxu2 %v951_v3  ;;  %967 = vmatpush.bf16.msra.mxu3 %v951_v3 }
  0x3f   : > { %410 = vmatpush.bf16.msra.mxu0 %v950_v4  ;;  %968 = vmatpush.bf16.msra.mxu1 %v950_v4 }
  0x40   : > { %969 = vmatpush.bf16.msra.mxu2 %v950_v4  ;;  %970 = vmatpush.bf16.msra.mxu3 %v950_v4 }
  0x43   : > { %411 = vmatpush.bf16.msra.mxu0 %v949_v5  ;;  %971 = vmatpush.bf16.msra.mxu1 %v949_v5 }
  0x44   : > { %972 = vmatpush.bf16.msra.mxu2 %v949_v5  ;;  %973 = vmatpush.bf16.msra.mxu3 %v949_v5 }
  0x47   : > { %412 = vmatpush.bf16.msra.mxu0 %v948_v6  ;;  %974 = vmatpush.bf16.msra.mxu1 %v948_v6 }
  0x48   : > { %975 = vmatpush.bf16.msra.mxu2 %v948_v6  ;;  %976 = vmatpush.bf16.msra.mxu3 %v948_v6 }
  0x4b   : > { %413 = vmatpush.bf16.msra.mxu0 %v947_v7  ;;  %977 = vmatpush.bf16.msra.mxu1 %v947_v7 }
  0x4c   : > { %978 = vmatpush.bf16.msra.mxu2 %v947_v7  ;;  %979 = vmatpush.bf16.msra.mxu3 %v947_v7 }
  0x4e   : > { %414 = vmatmul.bf16.vlgmr.msra.gmra.mxu0 %v931_v8  ;;  %434 = vmatmul.bf16.vlgmr.msra.gmra.mxu1 %v935_v9 }
  0x4f   : > { %454 = vmatmul.bf16.vlgmr.msra.gmra.mxu2 %v939_v10  ;;  %474 = vmatmul.bf16.vlgmr.msra.gmra.mxu3 %v943_v11 }
  0x5e   : > { %419 = vmatmul.bf16.gmra.mxu0 %v932_v12  ;;  %439 = vmatmul.bf16.gmra.mxu1 %v936_v13 }
  0x5f   : > { %459 = vmatmul.bf16.gmra.mxu2 %v940_v14  ;;  %479 = vmatmul.bf16.gmra.mxu3 %v944_v15 }
  0x6e   : > { %424 = vmatmul.bf16.gmra.mxu0 %v933_v16  ;;  %444 = vmatmul.bf16.gmra.mxu1 %v937_v17 }
  0x6f   : > { %464 = vmatmul.bf16.gmra.mxu2 %v941_v18  ;;  %484 = vmatmul.bf16.gmra.mxu3 %v945_v19 }
  0x7e   : > { %429 = vmatmul.bf16.gmra.mxu0 %v934_v20  ;;  %449 = vmatmul.bf16.gmra.mxu1 %v938_v21 }
  0x7f   : > { %469 = vmatmul.bf16.gmra.mxu2 %v942_v22  ;;  %489 = vmatmul.bf16.gmra.mxu3 %v946_v23 }
  0xcb   : > { %v415_v25 = vpop.f32.mrf.mxu0  ;;  %v435_v26 = vpop.f32.mrf.mxu1 }
  0xcc   : > { %v416_v27 = vadd.f32 %v1459_v24, %v415_v25  ;;  %v436_v28 = vadd.f32 %v1459_v24, %v435_v26 }
  0xce   : > { %v495_v29 = vsub.f32 0.0, %v416_v27  ;;  %v503_v30 = vsub.f32 0.0, %v436_v28 }
  0xd0   : > { %v527_v31 = vmul.f32 1.442695, %v495_v29  ;;  %v543_v32 = vmul.f32 1.442695, %v503_v30 }
  0xd2   : > { %1042 = vpow2.f32 %v527_v31  ;;  %v455_v33 = vpop.f32.mrf.mxu2  ;;  %v475_v34 = vpop.f32.mrf.mxu3 }
  0xd3   : > { %1044 = vpow2.f32 %v543_v32  ;;  %v1464_v35 = vadd.f32 %v1459_v24, %v455_v33  ;;  %v1467_v36 = vadd.f32 %v1459_v24, %v475_v34  ;;  %v417_v37 = vpop.f32.mrf.mxu0  ;;  %v437_v38 = vpop.f32.mrf.mxu1 }
  0xd4   : > { %v1470_v39 = vadd.f32 %v1459_v24, %v417_v37  ;;  %v1473_v40 = vadd.f32 %v1459_v24, %v437_v38 }
  0xd5   : > { %v511_v41 = vsub.f32 0.0, %v1464_v35  ;;  %v519_v42 = vsub.f32 0.0, %v1467_v36 }
  0xd6   : > { %v496_v43 = vsub.f32 0.0, %v1470_v39  ;;  %v504_v44 = vsub.f32 0.0, %v1473_v40 }
  0xd7   : > { %v559_v45 = vmul.f32 1.442695, %v511_v41  ;;  %v575_v46 = vmul.f32 1.442695, %v519_v42 }
  0xd8   : > { %v1043_v47 = vpop.eup %1042  ;;  %v529_v50 = vmul.f32 1.442695, %v496_v43  ;;  %v545_v52 = vmul.f32 1.442695, %v504_v44 }
  0xd9   : > { %v1045_v48 = vpop.eup %1044  ;;  %v591_v49 = vadd.f32 1.0, %v1043_v47  ;;  %1046 = vpow2.f32 %v559_v45 }
  0xda   : > { %v599_v51 = vadd.f32 1.0, %v1045_v48  ;;  %1048 = vpow2.f32 %v575_v46  ;;  %v457_v53 = vpop.f32.mrf.mxu2  ;;  %v477_v54 = vpop.f32.mrf.mxu3 }
  0xdb   : > { %1050 = vrcp.f32 %v591_v49  ;;  %v1480_v55 = vadd.f32 %v1459_v24, %v457_v53  ;;  %v1483_v56 = vadd.f32 %v1459_v24, %v477_v54  ;;  %v420_v57 = vpop.f32.mrf.mxu0  ;;  %v440_v58 = vpop.f32.mrf.mxu1 }
  0xdc   : > { %1052 = vrcp.f32 %v599_v51  ;;  %v1486_v59 = vadd.f32 %v1459_v24, %v420_v57  ;;  %v1489_v60 = vadd.f32 %v1459_v24, %v440_v58 }
  0xdd   : > { %1054 = vpow2.f32 %v529_v50  ;;  %v512_v61 = vsub.f32 0.0, %v1480_v55  ;;  %v520_v62 = vsub.f32 0.0, %v1483_v56 }
  0xde   : > { %1056 = vpow2.f32 %v545_v52  ;;  %v497_v63 = vsub.f32 0.0, %v1486_v59  ;;  %v505_v0 = vsub.f32 0.0, %v1489_v60 }
  0xdf   : > { %v1047_v1 = vpop.eup %1046  ;;  %v561_v2 = vmul.f32 1.442695, %v512_v61  ;;  %v577_v5 = vmul.f32 1.442695, %v520_v62 }
  0xe0   : > { %v1049_v3 = vpop.eup %1048  ;;  %v607_v4 = vadd.f32 1.0, %v1047_v1  ;;  %v531_v8 = vmul.f32 1.442695, %v497_v63  ;;  %v547_v11 = vmul.f32 1.442695, %v505_v0 }
  0xe1   : > { %v1051_v6 = vpop.eup %1050  ;;  %v615_v7 = vadd.f32 1.0, %v1049_v3  ;;  %1058 = vpow2.f32 %v561_v2 }
  0xe2   : > { %v1053_v9 = vpop.eup %1052  ;;  %v655_v10 = vmul.f32 %v1051_v6, %v416_v27  ;;  %1060 = vrcp.f32 %v607_v4  ;;  %v460_v12 = vpop.f32.mrf.mxu2 }
  0xe3   : > { %v480_v13 = vpop.f32.mrf.mxu3  ;;  %v1055_v14 = vpop.eup %1054  ;;  %v663_v15 = vmul.f32 %v1053_v9, %v436_v28  ;;  %1062 = vrcp.f32 %v615_v7  ;;  %v1497_v16 = vadd.f32 %v1459_v24, %v460_v12 }
  0xe4   : > { %v1500_v17 = vadd.f32 %v1459_v24, %v480_v13  ;;  %v422_v18 = vpop.f32.mrf.mxu0  ;;  %v442_v19 = vpop.f32.mrf.mxu1  ;;  %687 = vst [vmem:[%s1502_s28] sm:$0xff] %v655_v10  ;;  %v592_v21 = vadd.f32 1.0, %v1055_v14  ;;  %1064 = vpow2.f32 %v577_v5 }
  0xe5   : > { %v1057_v20 = vpop.eup %1056  ;;  %v1506_v22 = vadd.f32 %v1459_v24, %v422_v18  ;;  %v1509_v23 = vadd.f32 %v1459_v24, %v442_v19  ;;  %695 = vst [vmem:[%s1502_s28 + $0x40] sm:$0xff] %v663_v15  ;;  %1066 = vpow2.f32 %v531_v8  ;;  %v513_v26 = vsub.f32 0.0, %v1497_v16 }
  0xe6   : > { %v600_v25 = vadd.f32 1.0, %v1057_v20  ;;  %v521_v27 = vsub.f32 0.0, %v1500_v17  ;;  %1068 = vrcp.f32 %v592_v21 }
  0xe7   : > { %v498_v28 = vsub.f32 0.0, %v1506_v22  ;;  %v506_v29 = vsub.f32 0.0, %v1509_v23  ;;  %v1059_v30 = vpop.eup %1058  ;;  %v563_v31 = vmul.f32 1.442695, %v513_v26 }
  0xe8   : > { %1070 = vrcp.f32 %v600_v25  ;;  %v579_v32 = vmul.f32 1.442695, %v521_v27  ;;  %v1061_v33 = vpop.eup %1060  ;;  %v608_v34 = vadd.f32 1.0, %v1059_v30 }
  0xe9   : > { %1072 = vpow2.f32 %v547_v11  ;;  %v533_v37 = vmul.f32 1.442695, %v498_v28  ;;  %v1063_v38 = vpop.eup %1062  ;;  %v671_v41 = vmul.f32 %v1061_v33, %v1464_v35  ;;  %v549_v44 = vmul.f32 1.442695, %v506_v29 }
  0xea   : > { %1074 = vpow2.f32 %v563_v31  ;;  %v1065_v42 = vpop.eup %1064  ;;  %v679_v43 = vmul.f32 %v1063_v38, %v1467_v36  ;;  %v462_v45 = vpop.f32.mrf.mxu2 }
  0xeb   : > { %1076 = vrcp.f32 %v608_v34  ;;  %v482_v46 = vpop.f32.mrf.mxu3  ;;  %v1067_v47 = vpop.eup %1066  ;;  %703 = vst [vmem:[%s1502_s28 + $0x80] sm:$0xff] %v671_v41  ;;  %v616_v48 = vadd.f32 1.0, %v1065_v42  ;;  %v1520_v49 = vadd.f32 %v1459_v24, %v462_v45 }
  0xec   : > { %1078 = vpow2.f32 %v579_v32  ;;  %v1523_v50 = vadd.f32 %v1459_v24, %v482_v46  ;;  %v425_v35 = vpop.f32.mrf.mxu0  ;;  %v445_v51 = vpop.f32.mrf.mxu1  ;;  %711 = vst [vmem:[%s1502_s28 + $0xc0] sm:$0xff] %v679_v43  ;;  %v593_v36 = vadd.f32 1.0, %v1067_v47 }
  0xed   : > { %v1069_v52 = vpop.eup %1068  ;;  %1080 = vpow2.f32 %v533_v37  ;;  %v1527_v53 = vadd.f32 %v1459_v24, %v425_v35  ;;  %v1530_v54 = vadd.f32 %v1459_v24, %v445_v51  ;;  %v514_v61 = vsub.f32 0.0, %v1520_v49 }
  0xee   : > { %v1071_v57 = vpop.eup %1070  ;;  %v656_v58 = vmul.f32 %v1069_v52, %v1470_v39  ;;  %1082 = vrcp.f32 %v616_v48  ;;  %v522_v62 = vsub.f32 0.0, %v1523_v50 }
  0xef   : > { %v1073_v63 = vpop.eup %1072  ;;  %v664_v0 = vmul.f32 %v1071_v57, %v1473_v40  ;;  %1084 = vrcp.f32 %v593_v36  ;;  %v499_v1 = vsub.f32 0.0, %v1527_v53  ;;  %v507_v2 = vsub.f32 0.0, %v1530_v54 }
  0xf0   : > { %v1075_v3 = vpop.eup %1074  ;;  %688 = vst [vmem:[%s1502_s28 + $0x8] sm:$0xff] %v656_v58  ;;  %v601_v4 = vadd.f32 1.0, %v1073_v63  ;;  %1086 = vpow2.f32 %v549_v44  ;;  %v565_v5 = vmul.f32 1.442695, %v514_v61  ;;  %v581_v9 = vmul.f32 1.442695, %v522_v62 }
  0xf1   : > { %v1077_v39 = vpop.eup %1076  ;;  %696 = vst [vmem:[%s1502_s28 + $0x48] sm:$0xff] %v664_v0  ;;  %v609_v6 = vadd.f32 1.0, %v1075_v3  ;;  %v535_v11 = vmul.f32 1.442695, %v499_v1  ;;  %v551_v12 = vmul.f32 1.442695, %v507_v2 }
  0xf2   : > { %v1079_v7 = vpop.eup %1078  ;;  %v672_v8 = vmul.f32 %v1077_v39, %v1480_v55  ;;  %1088 = vrcp.f32 %v601_v4  ;;  %v465_v13 = vpop.f32.mrf.mxu2 }
  0xf3   : > { %v1081_v40 = vpop.eup %1080  ;;  %1090 = vrcp.f32 %v609_v6  ;;  %v617_v10 = vadd.f32 1.0, %v1079_v7  ;;  %v485_v14 = vpop.f32.mrf.mxu3  ;;  %v1543_v19 = vadd.f32 %v1459_v24, %v465_v13 }
  0xf4   : > { %v1083_v15 = vpop.eup %1082  ;;  %704 = vst [vmem:[%s1502_s28 + $0x88] sm:$0xff] %v672_v8  ;;  %v594_v18 = vadd.f32 1.0, %v1081_v40  ;;  %1092 = vpow2.f32 %v565_v5  ;;  %v1546_v20 = vadd.f32 %v1459_v24, %v485_v14  ;;  %v427_v55 = vpop.f32.mrf.mxu0 }
  0xf5   : > { %v447_v21 = vpop.f32.mrf.mxu1  ;;  %v1085_v25 = vpop.eup %1084  ;;  %v680_v26 = vmul.f32 %v1083_v15, %v1483_v56  ;;  %1094 = vrcp.f32 %v617_v10  ;;  %v1550_v27 = vadd.f32 %v1459_v24, %v427_v55  ;;  %v515_v31 = vsub.f32 0.0, %v1543_v19 }
  0xf6   : > { %v1553_v28 = vadd.f32 %v1459_v24, %v447_v21  ;;  %v1087_v29 = vpop.eup %1086  ;;  %v657_v30 = vmul.f32 %v1085_v25, %v1486_v59  ;;  %1096 = vrcp.f32 %v594_v18  ;;  %v523_v32 = vsub.f32 0.0, %v1546_v20 }
  0xf7   : > { %712 = vst [vmem:[%s1502_s28 + $0xc8] sm:$0xff] %v680_v26  ;;  %v602_v33 = vadd.f32 1.0, %v1087_v29  ;;  %1098 = vpow2.f32 %v581_v9  ;;  %v500_v56 = vsub.f32 0.0, %v1550_v27  ;;  %v567_v38 = vmul.f32 1.442695, %v515_v31 }
  0xf8   : > { %v508_v34 = vsub.f32 0.0, %v1553_v28  ;;  %v1089_v37 = vpop.eup %1088  ;;  %689 = vst [vmem:[%s1502_s28 + $0x10] sm:$0xff] %v657_v30  ;;  %1100 = vpow2.f32 %v535_v11  ;;  %v583_v41 = vmul.f32 1.442695, %v523_v32 }
  0xf9   : > { %v1091_v59 = vpop.eup %1090  ;;  %v665_v42 = vmul.f32 %v1089_v37, %v1489_v60  ;;  %1102 = vrcp.f32 %v602_v33  ;;  %v537_v45 = vmul.f32 1.442695, %v500_v56 }
  0xfa   : > { %v1093_v43 = vpop.eup %1092  ;;  %v673_v44 = vmul.f32 %v1091_v59, %v1497_v16  ;;  %1104 = vpow2.f32 %v551_v12  ;;  %v553_v48 = vmul.f32 1.442695, %v508_v34  ;;  %v467_v35 = vpop.f32.mrf.mxu2 }
  0xfb   : > { %v1095_v46 = vpop.eup %1094  ;;  %697 = vst [vmem:[%s1502_s28 + $0x50] sm:$0xff] %v665_v42  ;;  %v610_v47 = vadd.f32 1.0, %v1093_v43  ;;  %1106 = vpow2.f32 %v567_v38  ;;  %v487_v51 = vpop.f32.mrf.mxu3  ;;  %v1568_v60 = vadd.f32 %v1459_v24, %v467_v35 }
  0xfc   : > { %v1097_v52 = vpop.eup %1096  ;;  %705 = vst [vmem:[%s1502_s28 + $0x90] sm:$0xff] %v673_v44  ;;  %v681_v36 = vmul.f32 %v1095_v46, %v1500_v17  ;;  %1108 = vpow2.f32 %v583_v41  ;;  %v1571_v16 = vadd.f32 %v1459_v24, %v487_v51  ;;  %v430_v57 = vpop.f32.mrf.mxu0 }
  0xfd   : > { %v450_v58 = vpop.f32.mrf.mxu1  ;;  %v1099_v61 = vpop.eup %1098  ;;  %v658_v62 = vmul.f32 %v1097_v52, %v1506_v22  ;;  %1110 = vrcp.f32 %v610_v47  ;;  %v1575_v63 = vadd.f32 %v1459_v24, %v430_v57  ;;  %v516_v2 = vsub.f32 0.0, %v1568_v60 }
  0xfe   : > { %v1578_v0 = vadd.f32 %v1459_v24, %v450_v58  ;;  %v1101_v17 = vpop.eup %1100  ;;  %713 = vst [vmem:[%s1502_s28 + $0xd0] sm:$0xff] %v681_v36  ;;  %v618_v1 = vadd.f32 1.0, %v1099_v61  ;;  %1112 = vpow2.f32 %v537_v45  ;;  %v524_v3 = vsub.f32 0.0, %v1571_v16 }
  0xff   : > { %v1103_v4 = vpop.eup %1102  ;;  %690 = vst [vmem:[%s1502_s28 + $0x18] sm:$0xff] %v658_v62  ;;  %v595_v5 = vadd.f32 1.0, %v1101_v17  ;;  %1114 = vpow2.f32 %v553_v48  ;;  %v501_v22 = vsub.f32 0.0, %v1575_v63  ;;  %v569_v8 = vmul.f32 1.442695, %v516_v2 }
 0x100   : > { %v509_v39 = vsub.f32 0.0, %v1578_v0  ;;  %v1105_v6 = vpop.eup %1104  ;;  %v666_v7 = vmul.f32 %v1103_v4, %v1509_v23  ;;  %1116 = vrcp.f32 %v618_v1  ;;  %v585_v12 = vmul.f32 1.442695, %v524_v3 }
 0x101   : > { %v1107_v9 = vpop.eup %1106  ;;  %1118 = vrcp.f32 %v595_v5  ;;  %v603_v40 = vadd.f32 1.0, %v1105_v6  ;;  %v539_v15 = vmul.f32 1.442695, %v501_v22 }
 0x102   : > { %v1109_v10 = vpop.eup %1108  ;;  %698 = vst [vmem:[%s1502_s28 + $0x58] sm:$0xff] %v666_v7  ;;  %v611_v11 = vadd.f32 1.0, %v1107_v9  ;;  %1120 = vpow2.f32 %v569_v8  ;;  %v555_v18 = vmul.f32 1.442695, %v509_v39  ;;  %v470_v55 = vpop.f32.mrf.mxu2 }
 0x103   : > { %v1111_v13 = vpop.eup %1110  ;;  %1122 = vrcp.f32 %v603_v40  ;;  %v619_v14 = vadd.f32 1.0, %v1109_v10  ;;  %v490_v21 = vpop.f32.mrf.mxu3  ;;  %v1590_v26 = vadd.f32 %v1459_v24, %v470_v55 }
 0x104   : > { %v1113_v25 = vpop.eup %1112  ;;  %v674_v23 = vmul.f32 %v1111_v13, %v1520_v49  ;;  %1124 = vrcp.f32 %v611_v11  ;;  %v1593_v29 = vadd.f32 %v1459_v24, %v490_v21  ;;  %v432_v30 = vpop.f32.mrf.mxu0 }
 0x105   : > { %v452_v31 = vpop.f32.mrf.mxu1  ;;  %v1115_v32 = vpop.eup %1114  ;;  %1126 = vrcp.f32 %v619_v14  ;;  %v596_v33 = vadd.f32 1.0, %v1113_v25  ;;  %v1596_v56 = vadd.f32 %v1459_v24, %v432_v30  ;;  %v517_v38 = vsub.f32 0.0, %v1590_v26 }
 0x106   : > { %v1599_v34 = vadd.f32 %v1459_v24, %v452_v31  ;;  %v1117_v37 = vpop.eup %1116  ;;  %706 = vst [vmem:[%s1502_s28 + $0x98] sm:$0xff] %v674_v23  ;;  %v604_v49 = vadd.f32 1.0, %v1115_v32  ;;  %1128 = vpow2.f32 %v585_v12  ;;  %v525_v41 = vsub.f32 0.0, %v1593_v29 }
 0x107   : > { %v1119_v59 = vpop.eup %1118  ;;  %v682_v42 = vmul.f32 %v1117_v37, %v1523_v50  ;;  %1130 = vrcp.f32 %v596_v33  ;;  %v502_v43 = vsub.f32 0.0, %v1596_v56  ;;  %v571_v47 = vmul.f32 1.442695, %v517_v38 }
 0x108   : > { %v510_v44 = vsub.f32 0.0, %v1599_v34  ;;  %v1121_v45 = vpop.eup %1120  ;;  %v659_v46 = vmul.f32 %v1119_v59, %v1527_v53  ;;  %1132 = vrcp.f32 %v604_v49  ;;  %v587_v51 = vmul.f32 1.442695, %v525_v41 }
 0x109   : > { %v1123_v48 = vpop.eup %1122  ;;  %714 = vst [vmem:[%s1502_s28 + $0xd8] sm:$0xff] %v682_v42  ;;  %v612_v35 = vadd.f32 1.0, %v1121_v45  ;;  %1134 = vpow2.f32 %v539_v15  ;;  %v541_v36 = vmul.f32 1.442695, %v502_v43 }
 0x10a   : > { %v1125_v52 = vpop.eup %1124  ;;  %691 = vst [vmem:[%s1502_s28 + $0x20] sm:$0xff] %v659_v46  ;;  %v667_v50 = vmul.f32 %v1123_v48, %v1530_v54  ;;  %1136 = vpow2.f32 %v555_v18  ;;  %v557_v53 = vmul.f32 1.442695, %v510_v44  ;;  %v472_v61 = vpop.f32.mrf.mxu2 }
 0x10b   : > { %v1127_v57 = vpop.eup %1126  ;;  %v675_v58 = vmul.f32 %v1125_v52, %v1543_v19  ;;  %1138 = vrcp.f32 %v612_v35  ;;  %v492_v62 = vpop.f32.mrf.mxu3  ;;  %v1615_v2 = vadd.f32 %v1459_v24, %v472_v61 }
 0x10c   : > { %v1129_v17 = vpop.eup %1128  ;;  %699 = vst [vmem:[%s1502_s28 + $0x60] sm:$0xff] %v667_v50  ;;  %v683_v1 = vmul.f32 %v1127_v57, %v1546_v20  ;;  %1140 = vpow2.f32 %v571_v47  ;;  %v1618_v54 = vadd.f32 %v1459_v24, %v492_v62 }
 0x10d   : > { %v1131_v3 = vpop.eup %1130  ;;  %707 = vst [vmem:[%s1502_s28 + $0xa0] sm:$0xff] %v675_v58  ;;  %v620_v19 = vadd.f32 1.0, %v1129_v17  ;;  %1142 = vpow2.f32 %v587_v51  ;;  %v518_v20 = vsub.f32 0.0, %v1615_v2 }
 0x10e   : > { %v1133_v4 = vpop.eup %1132  ;;  %715 = vst [vmem:[%s1502_s28 + $0xe0] sm:$0xff] %v683_v1  ;;  %v660_v5 = vmul.f32 %v1131_v3, %v1550_v27  ;;  %1144 = vpow2.f32 %v541_v36  ;;  %v526_v8 = vsub.f32 0.0, %v1618_v54 }
 0x10f   : > { %v1135_v22 = vpop.eup %1134  ;;  %v668_v39 = vmul.f32 %v1133_v4, %v1553_v28  ;;  %1146 = vrcp.f32 %v620_v19  ;;  %v573_v7 = vmul.f32 1.442695, %v518_v20 }
 0x110   : > { %v1137_v6 = vpop.eup %1136  ;;  %692 = vst [vmem:[%s1502_s28 + $0x28] sm:$0xff] %v660_v5  ;;  %v597_v24 = vadd.f32 1.0, %v1135_v22  ;;  %1148 = vpow2.f32 %v557_v53  ;;  %v589_v14 = vmul.f32 1.442695, %v526_v8 }
 0x111   : > { %v1139_v9 = vpop.eup %1138  ;;  %700 = vst [vmem:[%s1502_s28 + $0x68] sm:$0xff] %v668_v39  ;;  %v605_v40 = vadd.f32 1.0, %v1137_v6 }
 0x112   : > { %v1141_v10 = vpop.eup %1140  ;;  %v676_v27 = vmul.f32 %v1139_v9, %v1568_v60  ;;  %1150 = vrcp.f32 %v597_v24 }
 0x113   : > { %v1143_v11 = vpop.eup %1142  ;;  %1152 = vrcp.f32 %v605_v40  ;;  %v613_v28 = vadd.f32 1.0, %v1141_v10 }
 0x114   : > { %v1145_v12 = vpop.eup %1144  ;;  %708 = vst [vmem:[%s1502_s28 + $0xa8] sm:$0xff] %v676_v27  ;;  %v621_v13 = vadd.f32 1.0, %v1143_v11  ;;  %1154 = vpow2.f32 %v573_v7 }
 0x115   : > { %v1147_v15 = vpop.eup %1146  ;;  %1156 = vrcp.f32 %v613_v28  ;;  %v598_v18 = vadd.f32 1.0, %v1145_v12 }
 0x116   : > { %v1149_v55 = vpop.eup %1148  ;;  %v684_v21 = vmul.f32 %v1147_v15, %v1571_v16  ;;  %1158 = vrcp.f32 %v621_v13 }
 0x117   : > { %1160 = vrcp.f32 %v598_v18  ;;  %v606_v60 = vadd.f32 1.0, %v1149_v55 }
 0x118   : > { %v1151_v25 = vpop.eup %1150  ;;  %716 = vst [vmem:[%s1502_s28 + $0xe8] sm:$0xff] %v684_v21  ;;  %1162 = vpow2.f32 %v589_v14 }
 0x119   : > { %v1153_v23 = vpop.eup %1152  ;;  %v661_v30 = vmul.f32 %v1151_v25, %v1575_v63  ;;  %1164 = vrcp.f32 %v606_v60 }
 0x11a   : > { %v1155_v31 = vpop.eup %1154  ;;  %v669_v32 = vmul.f32 %v1153_v23, %v1578_v0 }
 0x11b   : > { %v1157_v33 = vpop.eup %1156  ;;  %693 = vst [vmem:[%s1502_s28 + $0x30] sm:$0xff] %v661_v30  ;;  %v614_v16 = vadd.f32 1.0, %v1155_v31 }
 0x11c   : > { %v1159_v37 = vpop.eup %1158  ;;  %701 = vst [vmem:[%s1502_s28 + $0x70] sm:$0xff] %v669_v32  ;;  %v677_v49 = vmul.f32 %v1157_v33, %v1590_v26 }
 0x11d   : > { %v1161_v38 = vpop.eup %1160  ;;  %v685_v41 = vmul.f32 %v1159_v37, %v1593_v29  ;;  %1166 = vrcp.f32 %v614_v16 }
 0x11e   : > { %v1163_v63 = vpop.eup %1162  ;;  %709 = vst [vmem:[%s1502_s28 + $0xb0] sm:$0xff] %v677_v49  ;;  %v662_v59 = vmul.f32 %v1161_v38, %v1596_v56 }
 0x11f   : > { %v1165_v0 = vpop.eup %1164  ;;  %717 = vst [vmem:[%s1502_s28 + $0xf0] sm:$0xff] %v685_v41  ;;  %v622_v42 = vadd.f32 1.0, %v1163_v63 }
 0x120   : > { %694 = vst [vmem:[%s1502_s28 + $0x38] sm:$0xff] %v662_v59  ;;  %v670_v43 = vmul.f32 %v1165_v0, %v1599_v34 }
 0x121   : > { %1168 = vrcp.f32 %v622_v42 }
 0x122   : > { %702 = vst [vmem:[%s1502_s28 + $0x78] sm:$0xff] %v670_v43 }
 0x123   : > { %v1167_v26 = vpop.eup %1166 }
 0x124   : > { %v678_v29 = vmul.f32 %v1167_v26, %v1615_v2 }
 0x126   : > { %710 = vst [vmem:[%s1502_s28 + $0xb8] sm:$0xff] %v678_v29 }
 0x127   : > { %v1169_v56 = vpop.eup %1168 }
 0x128   : > { %v686_v44 = vmul.f32 %v1169_v56, %v1618_v54 }
 0x12a   : > { %718 = vst [vmem:[%s1502_s28 + $0xf8] sm:$0xff] %v686_v44 }
 0x12b   : > { %1257 = shalt.err (!%p1254_p10)
}
 0x12c   : > { %s1305_s6 = smov 128   ;;  %s1306_s18 = smov 8  }
 0x12d   : > { %986 = dma.vmem_to_hbm [thread:$0]  (%p1396_p3), %s733_s29, 4096, %s735_s16, %s720_s30, %s1305_s6, %s1305_s6, %s1306_s18  }
 0x12e PF: > { %s749_s23 = sand.u32 1, %s1288_s12   ;;  %p1691_p12 = scmp.ge.s32.totalorder %s1300_s15, 2 }
 0x12f   : > { %s750_s27 = scalar_lea.sflag [#allocation4], %s749_s23 }
 0x130   : > { %p997_p13 = pnand %p1691_p12, %p1362_p6 }
 0x132   : > { %p998_p0 = pneg %p997_p13 }
 0x134   : > { %1283 = dma.done.wait (%p998_p0), %s750_s27, 4096  }
 0x135   : > { %1285 = vsyncadd (%p998_p0), %s750_s27, 4294963200  ;;  %p17_p5 = scmp.ge.s32.totalorder %s1380_s26, 4   ;;  %s1692_s12 = smov %s1292_s13 }
 0x136   : > { %s1693_s13 = smov %s1296_s14  ;;  %s1694_s14 = smov %s1392_s4 }
 0x137   : > { %s1695_s15 = smov %s1380_s26  ;;  %19 = sbr.rel (!%p17_p5) target bundleno = 6 (0x6), region = 81 }
 0x13c   :  { %756 = vsyncpa [#allocation3], 1 }
 0x13d   :  { %758 = vsyncpa [#allocation3 + $0x1], 1 }
 0x13e   :  { %759 = vsyncpa [#allocation6], 1 }
 0x13f   :  { %760 = vsyncpa [#allocation4], 1 }
 0x140   :  { %762 = vsyncpa [#allocation4 + $0x1], 1 }

</bundles_post_ra>
